<compile_context>
chip_gen: v7x
topology: tpu7x:2x2x1
jax: 0.10.0
libtpu: 0.0.40
codegen_flags: <defaults>
</compile_context>

<pallas_src>
import functools
import math

import jax
import jax.numpy as jnp
import numpy as np
from jax.experimental import pallas as pl
from jax.experimental.pallas import tpu as pltpu

EPS = 1e-5  # PyTorch nn.LayerNorm default


def _layernorm_f32(x, g, b):
    mu = jnp.mean(x, axis=-1, keepdims=True)
    var = jnp.mean((x - mu) ** 2, axis=-1, keepdims=True)
    return (x - mu) * jax.lax.rsqrt(var + EPS) * g + b


def encoder_kernel(x_ref,
                   wqkv_ref, bqkv_ref,
                   wo_ref, bo_ref,
                   g1_ref, be1_ref, g2_ref, be2_ref,
                   w1_ref, b1_ref, w2_ref, b2_ref,
                   gf_ref, bf_ref,
                   o_ref,
                   *, n_heads, head_dim):
    S, E = x_ref.shape

    x = x_ref[...]                                            # [S, E] f32

    # Fused QKV projection.  1/sqrt(head_dim) is already folded into the Q
    # columns / Q bias of wqkv (done in f32 in the wrapper before the bf16
    # cast).  bf16 operands, f32 accumulation.
    qkv = jnp.dot(x.astype(jnp.bfloat16), wqkv_ref[...],
                  preferred_element_type=jnp.float32) + bqkv_ref[...]   # [S, 3E]

    # Per-head tensors via reshape + one transpose each (no per-head loop,
    # no stacks/concats).  Layout: [H, S, D], head as the batch axis.
    q = jnp.transpose(qkv[:, 0 * E:1 * E].reshape(S, n_heads, head_dim), (1, 0, 2))
    k = jnp.transpose(qkv[:, 1 * E:2 * E].reshape(S, n_heads, head_dim), (1, 0, 2))
    v = jnp.transpose(qkv[:, 2 * E:3 * E].reshape(S, n_heads, head_dim), (1, 0, 2))

    # One batched contraction over all heads for scores and context.
    s = jnp.einsum('hqd,hkd->hqk',
                   q.astype(jnp.bfloat16), k.astype(jnp.bfloat16),
                   preferred_element_type=jnp.float32)        # [H, S, S]
    s = s - jnp.max(s, axis=-1, keepdims=True)
    p = jnp.exp(s)
    p = p * pl.reciprocal(jnp.sum(p, axis=-1, keepdims=True), approx=True)
    # P·V kept in f32 (tiny shapes; tightens accuracy vs. bf16 P).
    ctx = jnp.einsum('hqk,hkd->hqd', p, v,
                     preferred_element_type=jnp.float32)      # [H, S, D]
    ctx = jnp.transpose(ctx, (1, 0, 2)).reshape(S, E)         # [S, E]

    attn = jnp.dot(ctx.astype(jnp.bfloat16), wo_ref[...],
                   preferred_element_type=jnp.float32) + bo_ref[...]
    x1 = _layernorm_f32(x + attn, g1_ref[...], be1_ref[...])

    h1 = jnp.maximum(
        jnp.dot(x1.astype(jnp.bfloat16), w1_ref[...],
                preferred_element_type=jnp.float32) + b1_ref[...], 0.0)
    ff = jnp.dot(h1.astype(jnp.bfloat16), w2_ref[...],
                 preferred_element_type=jnp.float32) + b2_ref[...]
    x2 = _layernorm_f32(x1 + ff, g2_ref[...], be2_ref[...])

    # Final Encoder.norm (reference returns right after layers[0]).
    o_ref[...] = _layernorm_f32(x2, gf_ref[...], bf_ref[...])


def init_params(key, config):
    E = config['emb_dim']
    F = 4 * E
    n_layers = config['n_layers']

    def dense(k, shape):
        return 0.02 * jax.random.normal(k, shape, jnp.float32)

    layers = []
    for _ in range(n_layers):
        keys = jax.random.split(key, 9)
        key = keys[0]
        layer = dict(
            Wq=dense(keys[1], (E, E)), bq=jnp.zeros((E,), jnp.float32),
            Wk=dense(keys[2], (E, E)), bk=jnp.zeros((E,), jnp.float32),
            Wv=dense(keys[3], (E, E)), bv=jnp.zeros((E,), jnp.float32),
            Wo=dense(keys[4], (E, E)), bo=0.01 * jnp.ones((E,), jnp.float32),
            g1=jnp.ones((E,), jnp.float32), be1=jnp.zeros((E,), jnp.float32),
            g2=jnp.ones((E,), jnp.float32), be2=jnp.zeros((E,), jnp.float32),
            W1=dense(keys[5], (F, E)), b1=0.01 * jnp.ones((F,), jnp.float32),
            W2=dense(keys[6], (E, F)), b2=0.01 * jnp.ones((E,), jnp.float32),
        )
        layers.append(layer)
    final = dict(gf=jnp.ones((E,), jnp.float32), bf=jnp.zeros((E,), jnp.float32))
    return layers, final


def encoder_forward_pallas(x, layers, final, config):
    B, S, E = x.shape
    H = config['n_heads']
    D = E // H
    F = 4 * E
    p = layers[0]  # Encoder.forward returns after the first layer (see note).

    # Fused QKV weight [E, 3E]; fold 1/sqrt(D) into Q weight AND Q bias in
    # f32, then cast weights to bf16 for the MXU.  LN params stay f32.
    inv_scale = jnp.float32(1.0 / math.sqrt(D))
    wqkv = jnp.concatenate([p['Wq'].T * inv_scale, p['Wk'].T, p['Wv'].T],
                           axis=1).astype(jnp.bfloat16)
    bqkv = jnp.concatenate([p['bq'] * inv_scale, p['bk'], p['bv']]).reshape(1, 3 * E)

    weights = [
        wqkv, bqkv,
        p['Wo'].T.astype(jnp.bfloat16), p['bo'].reshape(1, E),
        p['g1'].reshape(1, E), p['be1'].reshape(1, E),
        p['g2'].reshape(1, E), p['be2'].reshape(1, E),
        p['W1'].T.astype(jnp.bfloat16), p['b1'].reshape(1, F),
        p['W2'].T.astype(jnp.bfloat16), p['b2'].reshape(1, E),
        final['gf'].reshape(1, E), final['bf'].reshape(1, E),
    ]

    # Lane-dense 2-D activation slab; per-grid-step block is one batch's
    # [S, E] rows (attention is batch-local, so this tiling is exact).
    x2d = x.reshape(B * S, E)

    in_specs = [pl.BlockSpec((S, E), lambda b: (b, 0))]
    for w in weights:
        in_specs.append(pl.BlockSpec(w.shape, lambda b: (0, 0)))
    out_spec = pl.BlockSpec((S, E), lambda b: (b, 0))

    kernel = functools.partial(encoder_kernel, n_heads=H, head_dim=D)

    out2d = pl.pallas_call(
        kernel,
        out_shape=jax.ShapeDtypeStruct((B * S, E), jnp.float32),
        grid=(B,),
        in_specs=in_specs,
        out_specs=out_spec,
        compiler_params=pltpu.CompilerParams(
            dimension_semantics=("parallel",)),
    )(x2d, *weights)
    return out2d.reshape(B, S, E)


def encoder_forward_ref(x, layers, final, config):
    """Pure-JAX f32 reference with intended PyTorch semantics (eval mode)."""
    E = config['emb_dim']
    H = config['n_heads']
    D = E // H
    p = layers[0]

    def ln(v, g, b):
        mu = jnp.mean(v, axis=-1, keepdims=True)
        var = jnp.mean((v - mu) ** 2, axis=-1, keepdims=True)
        return (v - mu) / jnp.sqrt(var + EPS) * g + b

    B, S, _ = x.shape
    q = x @ p['Wq'].T + p['bq']
    k = x @ p['Wk'].T + p['bk']
    v = x @ p['Wv'].T + p['bv']
    q = q.reshape(B, S, H, D).transpose(0, 2, 1, 3)
    k = k.reshape(B, S, H, D).transpose(0, 2, 1, 3)
    v = v.reshape(B, S, H, D).transpose(0, 2, 1, 3)
    s = (q @ k.transpose(0, 1, 3, 2)) / np.sqrt(D)
    w = jax.nn.softmax(s, axis=-1)
    ctx = (w @ v).transpose(0, 2, 1, 3).reshape(B, S, E)
    attn = ctx @ p['Wo'].T + p['bo']
    x1 = ln(x + attn, p['g1'], p['be1'])
    ff = jnp.maximum(x1 @ p['W1'].T + p['b1'], 0.0) @ p['W2'].T + p['b2']
    x2 = ln(x1 + ff, p['g2'], p['be2'])
    return ln(x2, final['gf'], final['bf'])


if __name__ == "__main__":
    config = dict(emb_dim=32, n_heads=4, drop_rate=0.1, qkv_bias=True, n_layers=2)
    B, S, E = 2, 8, config['emb_dim']

    key = jax.random.PRNGKey(0)
    kx, kp = jax.random.split(key)
    x = jax.random.normal(kx, (B, S, E), jnp.float32)
    layers, final = init_params(kp, config)

    out = encoder_forward_pallas(x, layers, final, config)
    out = jax.block_until_ready(out)

    ref = encoder_forward_ref(x, layers, final, config)
    # bf16 MXU operands (f32 accumulation) → slightly looser tolerance.
    np.testing.assert_allclose(np.asarray(out), np.asarray(ref),
                               rtol=2e-2, atol=2e-2)
    print("KERNEL_OK")
</pallas_src>

<mosaic_0001>
module attributes {stable_mosaic.version = 11 : i64} {
  func.func @encoder_kernel(%arg0: i32, %arg1: memref<8x32xf32, #tpu.memory_space<vmem>>, %arg2: memref<32x96xbf16, #tpu.memory_space<vmem>>, %arg3: memref<1x96xf32, #tpu.memory_space<vmem>>, %arg4: memref<32x32xbf16, #tpu.memory_space<vmem>>, %arg5: memref<1x32xf32, #tpu.memory_space<vmem>>, %arg6: memref<1x32xf32, #tpu.memory_space<vmem>>, %arg7: memref<1x32xf32, #tpu.memory_space<vmem>>, %arg8: memref<1x32xf32, #tpu.memory_space<vmem>>, %arg9: memref<1x32xf32, #tpu.memory_space<vmem>>, %arg10: memref<32x128xbf16, #tpu.memory_space<vmem>>, %arg11: memref<1x128xf32, #tpu.memory_space<vmem>>, %arg12: memref<128x32xbf16, #tpu.memory_space<vmem>>, %arg13: memref<1x32xf32, #tpu.memory_space<vmem>>, %arg14: memref<1x32xf32, #tpu.memory_space<vmem>>, %arg15: memref<1x32xf32, #tpu.memory_space<vmem>>, %arg16: memref<8x32xf32, #tpu.memory_space<vmem>>) attributes {dimension_semantics = [#tpu.dimension_semantics<parallel>], iteration_bounds = array<i64: 2>, scalar_prefetch = 0 : i64, scratch_operands = 0 : i64, tpu.core_type = #tpu.core_type<tc>, window_params = [{transform_indices = @transform_0, window_bounds = array<i64: 8, 32>}, {pipeline_mode = #tpu.pipeline_mode<synchronous>, transform_indices = @transform_1, window_bounds = array<i64: 32, 96>}, {pipeline_mode = #tpu.pipeline_mode<synchronous>, transform_indices = @transform_2, window_bounds = array<i64: 1, 96>}, {pipeline_mode = #tpu.pipeline_mode<synchronous>, transform_indices = @transform_3, window_bounds = array<i64: 32, 32>}, {pipeline_mode = #tpu.pipeline_mode<synchronous>, transform_indices = @transform_4, window_bounds = array<i64: 1, 32>}, {pipeline_mode = #tpu.pipeline_mode<synchronous>, transform_indices = @transform_5, window_bounds = array<i64: 1, 32>}, {pipeline_mode = #tpu.pipeline_mode<synchronous>, transform_indices = @transform_6, window_bounds = array<i64: 1, 32>}, {pipeline_mode = #tpu.pipeline_mode<synchronous>, transform_indices = @transform_7, window_bounds = array<i64: 1, 32>}, {pipeline_mode = #tpu.pipeline_mode<synchronous>, transform_indices = @transform_8, window_bounds = array<i64: 1, 32>}, {pipeline_mode = #tpu.pipeline_mode<synchronous>, transform_indices = @transform_9, window_bounds = array<i64: 32, 128>}, {pipeline_mode = #tpu.pipeline_mode<synchronous>, transform_indices = @transform_10, window_bounds = array<i64: 1, 128>}, {pipeline_mode = #tpu.pipeline_mode<synchronous>, transform_indices = @transform_11, window_bounds = array<i64: 128, 32>}, {pipeline_mode = #tpu.pipeline_mode<synchronous>, transform_indices = @transform_12, window_bounds = array<i64: 1, 32>}, {pipeline_mode = #tpu.pipeline_mode<synchronous>, transform_indices = @transform_13, window_bounds = array<i64: 1, 32>}, {pipeline_mode = #tpu.pipeline_mode<synchronous>, transform_indices = @transform_14, window_bounds = array<i64: 1, 32>}, {transform_indices = @transform_15, window_bounds = array<i64: 8, 32>}]} {
    %c0 = arith.constant 0 : index
    %c0_0 = arith.constant 0 : index
    %0 = vector.load %arg1[%c0, %c0_0] : memref<8x32xf32, #tpu.memory_space<vmem>>, vector<8x32xf32>
    %1 = arith.truncf %0 : vector<8x32xf32> to vector<8x32xbf16>
    %c0_1 = arith.constant 0 : index
    %c0_2 = arith.constant 0 : index
    %2 = vector.load %arg2[%c0_1, %c0_2] : memref<32x96xbf16, #tpu.memory_space<vmem>>, vector<32x96xbf16>
    %cst = arith.constant dense<0.000000e+00> : vector<8x96xf32>
    %3 = tpu.matmul %1, %2, %cst {dimension_numbers = #tpu.dot_dimension_numbers<[1], [0], [0], [1], [0, 0, 1, 1], [], []>} : vector<8x32xbf16>, vector<32x96xbf16>, vector<8x96xf32> -> vector<8x96xf32>
    %c0_3 = arith.constant 0 : index
    %c0_4 = arith.constant 0 : index
    %4 = vector.load %arg3[%c0_3, %c0_4] : memref<1x96xf32, #tpu.memory_space<vmem>>, vector<1x96xf32>
    %5 = vector.broadcast %4 : vector<1x96xf32> to vector<8x96xf32>
    %6 = arith.addf %3, %5 : vector<8x96xf32>
    %7 = vector.extract_strided_slice %6 {offsets = [0, 0], sizes = [8, 32], strides = [1, 1]} : vector<8x96xf32> to vector<8x32xf32>
    %8 = vector.shape_cast %7 : vector<8x32xf32> to vector<8x4x8xf32>
    %9 = tpu.transpose %8, [1, 0, 2] : vector<8x4x8xf32> -> vector<4x8x8xf32>
    %10 = vector.extract_strided_slice %6 {offsets = [0, 32], sizes = [8, 32], strides = [1, 1]} : vector<8x96xf32> to vector<8x32xf32>
    %11 = vector.shape_cast %10 : vector<8x32xf32> to vector<8x4x8xf32>
    %12 = tpu.transpose %11, [1, 0, 2] : vector<8x4x8xf32> -> vector<4x8x8xf32>
    %13 = vector.extract_strided_slice %6 {offsets = [0, 64], sizes = [8, 32], strides = [1, 1]} : vector<8x96xf32> to vector<8x32xf32>
    %14 = vector.shape_cast %13 : vector<8x32xf32> to vector<8x4x8xf32>
    %15 = tpu.transpose %14, [1, 0, 2] : vector<8x4x8xf32> -> vector<4x8x8xf32>
    %16 = arith.truncf %9 : vector<4x8x8xf32> to vector<4x8x8xbf16>
    %17 = arith.truncf %12 : vector<4x8x8xf32> to vector<4x8x8xbf16>
    "tpu.trace_start"() <{level = 10 : i32, message = "hqd,hkd->hqk"}> : () -> ()
    %cst_5 = arith.constant dense<0.000000e+00> : vector<4x8x8xf32>
    %18 = tpu.matmul %16, %17, %cst_5 {dimension_numbers = #tpu.dot_dimension_numbers<[2], [2], [1], [1], [0, 0, 0, 1, 1, 1], [0], [0]>} : vector<4x8x8xbf16>, vector<4x8x8xbf16>, vector<4x8x8xf32> -> vector<4x8x8xf32>
    "tpu.trace_stop"() : () -> ()
    %cst_6 = arith.constant dense<0xFF800000> : vector<4x8xf32>
    %19 = vector.multi_reduction <maximumf>, %18, %cst_6 [2] : vector<4x8x8xf32> to vector<4x8xf32>
    %20 = vector.shape_cast %19 : vector<4x8xf32> to vector<4x8x1xf32>
    %21 = vector.broadcast %20 : vector<4x8x1xf32> to vector<4x8x8xf32>
    %22 = arith.subf %18, %21 : vector<4x8x8xf32>
    %23 = math.exp %22 : vector<4x8x8xf32>
    %cst_7 = arith.constant dense<0.000000e+00> : vector<4x8xf32>
    %24 = vector.multi_reduction <add>, %23, %cst_7 [2] : vector<4x8x8xf32> to vector<4x8xf32>
    %25 = vector.shape_cast %24 : vector<4x8xf32> to vector<4x8x1xf32>
    %26 = tpu.reciprocal %25 {approx = true} : vector<4x8x1xf32> -> vector<4x8x1xf32>
    %27 = vector.broadcast %26 : vector<4x8x1xf32> to vector<4x8x8xf32>
    %28 = arith.mulf %23, %27 : vector<4x8x8xf32>
    "tpu.trace_start"() <{level = 10 : i32, message = "hqk,hkd->hqd"}> : () -> ()
    %cst_8 = arith.constant dense<0.000000e+00> : vector<4x8x8xf32>
    %29 = tpu.matmul %28, %15, %cst_8 {dimension_numbers = #tpu.dot_dimension_numbers<[2], [1], [1], [2], [0, 0, 0, 1, 1, 2], [0], [0]>} : vector<4x8x8xf32>, vector<4x8x8xf32>, vector<4x8x8xf32> -> vector<4x8x8xf32>
    "tpu.trace_stop"() : () -> ()
    %30 = tpu.transpose %29, [1, 0, 2] : vector<4x8x8xf32> -> vector<8x4x8xf32>
    %31 = vector.shape_cast %30 : vector<8x4x8xf32> to vector<8x32xf32>
    %32 = arith.truncf %31 : vector<8x32xf32> to vector<8x32xbf16>
    %c0_9 = arith.constant 0 : index
    %c0_10 = arith.constant 0 : index
    %33 = vector.load %arg4[%c0_9, %c0_10] : memref<32x32xbf16, #tpu.memory_space<vmem>>, vector<32x32xbf16>
    %cst_11 = arith.constant dense<0.000000e+00> : vector<8x32xf32>
    %34 = tpu.matmul %32, %33, %cst_11 {dimension_numbers = #tpu.dot_dimension_numbers<[1], [0], [0], [1], [0, 0, 1, 1], [], []>} : vector<8x32xbf16>, vector<32x32xbf16>, vector<8x32xf32> -> vector<8x32xf32>
    %c0_12 = arith.constant 0 : index
    %c0_13 = arith.constant 0 : index
    %35 = vector.load %arg5[%c0_12, %c0_13] : memref<1x32xf32, #tpu.memory_space<vmem>>, vector<1x32xf32>
    %36 = vector.broadcast %35 : vector<1x32xf32> to vector<8x32xf32>
    %37 = arith.addf %34, %36 : vector<8x32xf32>
    %38 = arith.addf %0, %37 : vector<8x32xf32>
    %c0_14 = arith.constant 0 : index
    %c0_15 = arith.constant 0 : index
    %39 = vector.load %arg6[%c0_14, %c0_15] : memref<1x32xf32, #tpu.memory_space<vmem>>, vector<1x32xf32>
    %c0_16 = arith.constant 0 : index
    %c0_17 = arith.constant 0 : index
    %40 = vector.load %arg7[%c0_16, %c0_17] : memref<1x32xf32, #tpu.memory_space<vmem>>, vector<1x32xf32>
    %cst_18 = arith.constant dense<0.000000e+00> : vector<8xf32>
    %41 = vector.multi_reduction <add>, %38, %cst_18 [1] : vector<8x32xf32> to vector<8xf32>
    %42 = vector.shape_cast %41 : vector<8xf32> to vector<8x1xf32>
    %cst_19 = arith.constant 3.200000e+01 : f32
    %43 = vector.broadcast %cst_19 : f32 to vector<8x1xf32>
    %44 = arith.divf %42, %43 : vector<8x1xf32>
    %45 = vector.broadcast %44 : vector<8x1xf32> to vector<8x32xf32>
    %46 = arith.subf %38, %45 : vector<8x32xf32>
    %47 = arith.mulf %46, %46 : vector<8x32xf32>
    %cst_20 = arith.constant dense<0.000000e+00> : vector<8xf32>
    %48 = vector.multi_reduction <add>, %47, %cst_20 [1] : vector<8x32xf32> to vector<8xf32>
    %49 = vector.shape_cast %48 : vector<8xf32> to vector<8x1xf32>
    %cst_21 = arith.constant 3.200000e+01 : f32
    %50 = vector.broadcast %cst_21 : f32 to vector<8x1xf32>
    %51 = arith.divf %49, %50 : vector<8x1xf32>
    %52 = vector.broadcast %44 : vector<8x1xf32> to vector<8x32xf32>
    %53 = arith.subf %38, %52 : vector<8x32xf32>
    %cst_22 = arith.constant 9.99999974E-6 : f32
    %54 = vector.broadcast %cst_22 : f32 to vector<8x1xf32>
    %55 = arith.addf %51, %54 : vector<8x1xf32>
    %56 = math.rsqrt %55 : vector<8x1xf32>
    %57 = vector.broadcast %56 : vector<8x1xf32> to vector<8x32xf32>
    %58 = arith.mulf %53, %57 : vector<8x32xf32>
    %59 = vector.broadcast %39 : vector<1x32xf32> to vector<8x32xf32>
    %60 = arith.mulf %58, %59 : vector<8x32xf32>
    %61 = vector.broadcast %40 : vector<1x32xf32> to vector<8x32xf32>
    %62 = arith.addf %60, %61 : vector<8x32xf32>
    %63 = arith.truncf %62 : vector<8x32xf32> to vector<8x32xbf16>
    %c0_23 = arith.constant 0 : index
    %c0_24 = arith.constant 0 : index
    %64 = vector.load %arg10[%c0_23, %c0_24] : memref<32x128xbf16, #tpu.memory_space<vmem>>, vector<32x128xbf16>
    %cst_25 = arith.constant dense<0.000000e+00> : vector<8x128xf32>
    %65 = tpu.matmul %63, %64, %cst_25 {dimension_numbers = #tpu.dot_dimension_numbers<[1], [0], [0], [1], [0, 0, 1, 1], [], []>} : vector<8x32xbf16>, vector<32x128xbf16>, vector<8x128xf32> -> vector<8x128xf32>
    %c0_26 = arith.constant 0 : index
    %c0_27 = arith.constant 0 : index
    %66 = vector.load %arg11[%c0_26, %c0_27] : memref<1x128xf32, #tpu.memory_space<vmem>>, vector<1x128xf32>
    %67 = vector.broadcast %66 : vector<1x128xf32> to vector<8x128xf32>
    %68 = arith.addf %65, %67 : vector<8x128xf32>
    %cst_28 = arith.constant 0.000000e+00 : f32
    %69 = vector.broadcast %cst_28 : f32 to vector<8x128xf32>
    %70 = arith.maximumf %68, %69 : vector<8x128xf32>
    %71 = arith.truncf %70 : vector<8x128xf32> to vector<8x128xbf16>
    %c0_29 = arith.constant 0 : index
    %c0_30 = arith.constant 0 : index
    %72 = vector.load %arg12[%c0_29, %c0_30] : memref<128x32xbf16, #tpu.memory_space<vmem>>, vector<128x32xbf16>
    %cst_31 = arith.constant dense<0.000000e+00> : vector<8x32xf32>
    %73 = tpu.matmul %71, %72, %cst_31 {dimension_numbers = #tpu.dot_dimension_numbers<[1], [0], [0], [1], [0, 0, 1, 1], [], []>} : vector<8x128xbf16>, vector<128x32xbf16>, vector<8x32xf32> -> vector<8x32xf32>
    %c0_32 = arith.constant 0 : index
    %c0_33 = arith.constant 0 : index
    %74 = vector.load %arg13[%c0_32, %c0_33] : memref<1x32xf32, #tpu.memory_space<vmem>>, vector<1x32xf32>
    %75 = vector.broadcast %74 : vector<1x32xf32> to vector<8x32xf32>
    %76 = arith.addf %73, %75 : vector<8x32xf32>
    %77 = arith.addf %62, %76 : vector<8x32xf32>
    %c0_34 = arith.constant 0 : index
    %c0_35 = arith.constant 0 : index
    %78 = vector.load %arg8[%c0_34, %c0_35] : memref<1x32xf32, #tpu.memory_space<vmem>>, vector<1x32xf32>
    %c0_36 = arith.constant 0 : index
    %c0_37 = arith.constant 0 : index
    %79 = vector.load %arg9[%c0_36, %c0_37] : memref<1x32xf32, #tpu.memory_space<vmem>>, vector<1x32xf32>
    %cst_38 = arith.constant dense<0.000000e+00> : vector<8xf32>
    %80 = vector.multi_reduction <add>, %77, %cst_38 [1] : vector<8x32xf32> to vector<8xf32>
    %81 = vector.shape_cast %80 : vector<8xf32> to vector<8x1xf32>
    %cst_39 = arith.constant 3.200000e+01 : f32
    %82 = vector.broadcast %cst_39 : f32 to vector<8x1xf32>
    %83 = arith.divf %81, %82 : vector<8x1xf32>
    %84 = vector.broadcast %83 : vector<8x1xf32> to vector<8x32xf32>
    %85 = arith.subf %77, %84 : vector<8x32xf32>
    %86 = arith.mulf %85, %85 : vector<8x32xf32>
    %cst_40 = arith.constant dense<0.000000e+00> : vector<8xf32>
    %87 = vector.multi_reduction <add>, %86, %cst_40 [1] : vector<8x32xf32> to vector<8xf32>
    %88 = vector.shape_cast %87 : vector<8xf32> to vector<8x1xf32>
    %cst_41 = arith.constant 3.200000e+01 : f32
    %89 = vector.broadcast %cst_41 : f32 to vector<8x1xf32>
    %90 = arith.divf %88, %89 : vector<8x1xf32>
    %91 = vector.broadcast %83 : vector<8x1xf32> to vector<8x32xf32>
    %92 = arith.subf %77, %91 : vector<8x32xf32>
    %cst_42 = arith.constant 9.99999974E-6 : f32
    %93 = vector.broadcast %cst_42 : f32 to vector<8x1xf32>
    %94 = arith.addf %90, %93 : vector<8x1xf32>
    %95 = math.rsqrt %94 : vector<8x1xf32>
    %96 = vector.broadcast %95 : vector<8x1xf32> to vector<8x32xf32>
    %97 = arith.mulf %92, %96 : vector<8x32xf32>
    %98 = vector.broadcast %78 : vector<1x32xf32> to vector<8x32xf32>
    %99 = arith.mulf %97, %98 : vector<8x32xf32>
    %100 = vector.broadcast %79 : vector<1x32xf32> to vector<8x32xf32>
    %101 = arith.addf %99, %100 : vector<8x32xf32>
    %c0_43 = arith.constant 0 : index
    %c0_44 = arith.constant 0 : index
    %102 = vector.load %arg14[%c0_43, %c0_44] : memref<1x32xf32, #tpu.memory_space<vmem>>, vector<1x32xf32>
    %c0_45 = arith.constant 0 : index
    %c0_46 = arith.constant 0 : index
    %103 = vector.load %arg15[%c0_45, %c0_46] : memref<1x32xf32, #tpu.memory_space<vmem>>, vector<1x32xf32>
    %cst_47 = arith.constant dense<0.000000e+00> : vector<8xf32>
    %104 = vector.multi_reduction <add>, %101, %cst_47 [1] : vector<8x32xf32> to vector<8xf32>
    %105 = vector.shape_cast %104 : vector<8xf32> to vector<8x1xf32>
    %cst_48 = arith.constant 3.200000e+01 : f32
    %106 = vector.broadcast %cst_48 : f32 to vector<8x1xf32>
    %107 = arith.divf %105, %106 : vector<8x1xf32>
    %108 = vector.broadcast %107 : vector<8x1xf32> to vector<8x32xf32>
    %109 = arith.subf %101, %108 : vector<8x32xf32>
    %110 = arith.mulf %109, %109 : vector<8x32xf32>
    %cst_49 = arith.constant dense<0.000000e+00> : vector<8xf32>
    %111 = vector.multi_reduction <add>, %110, %cst_49 [1] : vector<8x32xf32> to vector<8xf32>
    %112 = vector.shape_cast %111 : vector<8xf32> to vector<8x1xf32>
    %cst_50 = arith.constant 3.200000e+01 : f32
    %113 = vector.broadcast %cst_50 : f32 to vector<8x1xf32>
    %114 = arith.divf %112, %113 : vector<8x1xf32>
    %115 = vector.broadcast %107 : vector<8x1xf32> to vector<8x32xf32>
    %116 = arith.subf %101, %115 : vector<8x32xf32>
    %cst_51 = arith.constant 9.99999974E-6 : f32
    %117 = vector.broadcast %cst_51 : f32 to vector<8x1xf32>
    %118 = arith.addf %114, %117 : vector<8x1xf32>
    %119 = math.rsqrt %118 : vector<8x1xf32>
    %120 = vector.broadcast %119 : vector<8x1xf32> to vector<8x32xf32>
    %121 = arith.mulf %116, %120 : vector<8x32xf32>
    %122 = vector.broadcast %102 : vector<1x32xf32> to vector<8x32xf32>
    %123 = arith.mulf %121, %122 : vector<8x32xf32>
    %124 = vector.broadcast %103 : vector<1x32xf32> to vector<8x32xf32>
    %125 = arith.addf %123, %124 : vector<8x32xf32>
    %c0_52 = arith.constant 0 : index
    %c0_53 = arith.constant 0 : index
    %126 = vector.load %arg16[%c0_52, %c0_53] : memref<8x32xf32, #tpu.memory_space<vmem>>, vector<8x32xf32>
    tpu.vector_store %arg16[%c0_52, %c0_53], %125 {strides = array<i32>} : memref<8x32xf32, #tpu.memory_space<vmem>>, vector<8x32xf32>,
    return
  }
  func.func @transform_0(%arg0: i32) -> (i32, i32) {
    %c0_i32 = arith.constant 0 : i32
    %c0_i32_0 = arith.constant 0 : i32
    return %arg0, %c0_i32 : i32, i32
  }
  func.func @transform_1(%arg0: i32) -> (i32, i32) {
    %c0_i32 = arith.constant 0 : i32
    %c0_i32_0 = arith.constant 0 : i32
    %c0_i32_1 = arith.constant 0 : i32
    return %c0_i32, %c0_i32_0 : i32, i32
  }
  func.func @transform_2(%arg0: i32) -> (i32, i32) {
    %c0_i32 = arith.constant 0 : i32
    %c0_i32_0 = arith.constant 0 : i32
    %c0_i32_1 = arith.constant 0 : i32
    return %c0_i32, %c0_i32_0 : i32, i32
  }
  func.func @transform_3(%arg0: i32) -> (i32, i32) {
    %c0_i32 = arith.constant 0 : i32
    %c0_i32_0 = arith.constant 0 : i32
    %c0_i32_1 = arith.constant 0 : i32
    return %c0_i32, %c0_i32_0 : i32, i32
  }
  func.func @transform_4(%arg0: i32) -> (i32, i32) {
    %c0_i32 = arith.constant 0 : i32
    %c0_i32_0 = arith.constant 0 : i32
    %c0_i32_1 = arith.constant 0 : i32
    return %c0_i32, %c0_i32_0 : i32, i32
  }
  func.func @transform_5(%arg0: i32) -> (i32, i32) {
    %c0_i32 = arith.constant 0 : i32
    %c0_i32_0 = arith.constant 0 : i32
    %c0_i32_1 = arith.constant 0 : i32
    return %c0_i32, %c0_i32_0 : i32, i32
  }
  func.func @transform_6(%arg0: i32) -> (i32, i32) {
    %c0_i32 = arith.constant 0 : i32
    %c0_i32_0 = arith.constant 0 : i32
    %c0_i32_1 = arith.constant 0 : i32
    return %c0_i32, %c0_i32_0 : i32, i32
  }
  func.func @transform_7(%arg0: i32) -> (i32, i32) {
    %c0_i32 = arith.constant 0 : i32
    %c0_i32_0 = arith.constant 0 : i32
    %c0_i32_1 = arith.constant 0 : i32
    return %c0_i32, %c0_i32_0 : i32, i32
  }
  func.func @transform_8(%arg0: i32) -> (i32, i32) {
    %c0_i32 = arith.constant 0 : i32
    %c0_i32_0 = arith.constant 0 : i32
    %c0_i32_1 = arith.constant 0 : i32
    return %c0_i32, %c0_i32_0 : i32, i32
  }
  func.func @transform_9(%arg0: i32) -> (i32, i32) {
    %c0_i32 = arith.constant 0 : i32
    %c0_i32_0 = arith.constant 0 : i32
    %c0_i32_1 = arith.constant 0 : i32
    return %c0_i32, %c0_i32_0 : i32, i32
  }
  func.func @transform_10(%arg0: i32) -> (i32, i32) {
    %c0_i32 = arith.constant 0 : i32
    %c0_i32_0 = arith.constant 0 : i32
    %c0_i32_1 = arith.constant 0 : i32
    return %c0_i32, %c0_i32_0 : i32, i32
  }
  func.func @transform_11(%arg0: i32) -> (i32, i32) {
    %c0_i32 = arith.constant 0 : i32
    %c0_i32_0 = arith.constant 0 : i32
    %c0_i32_1 = arith.constant 0 : i32
    return %c0_i32, %c0_i32_0 : i32, i32
  }
  func.func @transform_12(%arg0: i32) -> (i32, i32) {
    %c0_i32 = arith.constant 0 : i32
    %c0_i32_0 = arith.constant 0 : i32
    %c0_i32_1 = arith.constant 0 : i32
    return %c0_i32, %c0_i32_0 : i32, i32
  }
  func.func @transform_13(%arg0: i32) -> (i32, i32) {
    %c0_i32 = arith.constant 0 : i32
    %c0_i32_0 = arith.constant 0 : i32
    %c0_i32_1 = arith.constant 0 : i32
    return %c0_i32, %c0_i32_0 : i32, i32
  }
  func.func @transform_14(%arg0: i32) -> (i32, i32) {
    %c0_i32 = arith.constant 0 : i32
    %c0_i32_0 = arith.constant 0 : i32
    %c0_i32_1 = arith.constant 0 : i32
    return %c0_i32, %c0_i32_0 : i32, i32
  }
  func.func @transform_15(%arg0: i32) -> (i32, i32) {
    %c0_i32 = arith.constant 0 : i32
    %c0_i32_0 = arith.constant 0 : i32
    return %arg0, %c0_i32 : i32, i32
  }
}

</mosaic_0001>

<bundles_post_ra>
// kernel: tpu_custom_call.1
= control target key start
LH: loop header
LB: loop body
LE: loop exit
PB: predicated region body
PF: predicated region fallthrough
CT: control target
= control target key end

     0   :  { %s2879_s0 = inlined_call_operand.vmem [shape: f32[16,32], index: 0, kind: input, shape index: {}]   ;;  %s2880_s1 = inlined_call_operand.vmem [shape: bf16[32,96], index: 1, kind: input, shape index: {}]   ;;  %s2881_s2 = inlined_call_operand.vmem [shape: f32[1,96], index: 2, kind: input, shape index: {}]   ;;  %s2882_s3 = inlined_call_operand.vmem [shape: bf16[32,32], index: 3, kind: input, shape index: {}]   ;;  %s2883_s4 = inlined_call_operand.vmem [shape: f32[1,32], index: 4, kind: input, shape index: {}]   ;;  %s2884_s5 = inlined_call_operand.vmem [shape: f32[1,32], index: 5, kind: input, shape index: {}]   ;;  %s2885_s6 = inlined_call_operand.vmem [shape: f32[1,32], index: 6, kind: input, shape index: {}]   ;;  %s2886_s7 = inlined_call_operand.vmem [shape: f32[1,32], index: 7, kind: input, shape index: {}]   ;;  %s2887_s8 = inlined_call_operand.vmem [shape: f32[1,32], index: 8, kind: input, shape index: {}]   ;;  %s2888_s9 = inlined_call_operand.vmem [shape: bf16[32,128], index: 9, kind: input, shape index: {}]   ;;  %s2889_s10 = inlined_call_operand.vmem [shape: f32[1,128], index: 10, kind: input, shape index: {}]   ;;  %s2890_s11 = inlined_call_operand.vmem [shape: bf16[128,32], index: 11, kind: input, shape index: {}]   ;;  %s2891_s12 = inlined_call_operand.vmem [shape: f32[1,32], index: 12, kind: input, shape index: {}]   ;;  %s2892_s13 = inlined_call_operand.vmem [shape: f32[1,32], index: 13, kind: input, shape index: {}]   ;;  %s2893_s14 = inlined_call_operand.vmem [shape: f32[1,32], index: 14, kind: input, shape index: {}]   ;;  %s2894_s15 = inlined_call_operand.hbm [shape: f32[16,32], index: 15, kind: output, shape index: {}]  }
   0x1   :  { %2895 = sst [smem:[#allocation6_spill]] %s2879_s0 }
   0x2   :  { %2896 = sst [smem:[#allocation7_spill]] %s2880_s1 }
   0x3   :  { %2897 = sst [smem:[#allocation8_spill]] %s2881_s2 }
   0x4   :  { %2898 = sst [smem:[#allocation9_spill]] %s2882_s3 }
   0x5   :  { %2899 = sst [smem:[#allocation10_spill]] %s2883_s4 }
   0x6   :  { %20 = vsyncpa [#allocation3], 0 }
   0x7   :  { %22 = vsyncpa [#allocation3 + $0x1], 0  ;;  %s2514_s18 = smov 0   ;;  %s2516_s19 = smov 0  }
   0x8   :  { %s2518_s20 = smov 0   ;;  %s2520_s21 = smov 0  }
   0x9 LB: > { %s2535_s22 = sadd.s32 4294967295, %s2419_s21   ;;  %s2095_s23 = sadd.s32 4294967294, %s2419_s21   ;;  %s2419_s21 = sphi %s2520_s21, %s2912_s21   ;;  %s2415_s20 = sphi %s2518_s20, %s2911_s20   ;;  %s2411_s19 = sphi %s2516_s19, %s2910_s19   ;;  %s2407_s18 = sphi %s2514_s18, %s2909_s18  }
   0xa   : > { %s2539_s24 = sadd.s32 1, %s2419_s21   ;;  %s355_s25 = sadd.s32 1, %s2415_s20 }
   0xb   : > { %s352_s26 = ssub.s32 %s2419_s21, %s2539_s24  ;;  %p365_p0 = scmp.ne.s32.totalorder %s2415_s20, %s2411_s19 }
   0xc   : > { %p353_p1 = scmp.eq.s32.totalorder %s352_s26, 0  ;;  %p366_p2 = scmp.eq.s32.totalorder %s2535_s22, 1 }
   0xd   : > { %p371_p3 = scmp.ne.s32.totalorder %s2411_s19, %s2407_s18  ;;  %p372_p4 = scmp.eq.s32.totalorder %s2095_s23, 1 }
   0xe   : > { %s2550_s27 = scalar_select %p353_p1, %s2415_s20, %s355_s25  }
   0xf   : > { %p2552_p5 = por %p366_p2, %p365_p0  ;;  %p2556_p6 = por %p372_p4, %p371_p3 }
  0x10   : > { %2900 = sst [smem:[#allocation5_spill]] %s2550_s27  ;;  %p2098_p7 = scmp.ge.s32.totalorder %s2419_s21, 1 }
  0x11   : > { %p439_p8 = scmp.lt.s32.totalorder %s2419_s21, 3 }
  0x13   : > { %p440_p9 = pnand %p2098_p7, %p439_p8 }
  0x14   : > { %s2903_s1 = sld [smem:[#allocation7_spill]] (!%p440_p9)  ;;  %v2421_v1 = vmov (!%p440_p9), 0.0   ;;  %vm2422_vm0 = vmmov (!%p440_p9), 0   ;;  %p486_p10 = scmp.lt.s32.totalorder (!%p440_p9), %s2535_s22, 1  ;;  %vm516_vm1 = vcmask (!%p440_p9), 261120   ;;  %v575_v16 = vlaneseq (!%p440_p9) }
  0x15   : > { %443 = sbr.rel (%p440_p9) target bundleno = 3047 (0xbe7), region = 80  ;;  %2182 = vmatprep.subr.bf16.mxu1 (!%p440_p9), %v2421_v1  ;;  %2208 = vmatprep.subr.bf16.mxu0 (!%p440_p9), %v2421_v1  ;;  %s2904_s0 = sld [smem:[#allocation6_spill]] (!%p440_p9)  ;;  %v2427_v14 = vmov (!%p440_p9), 1983009808   ;;  %v2428_v19 = vmov (!%p440_p9), 1934713408  }
  0x16   : > { %2186 = vmatprep.mubr.msk.bf16.mxu1 (!%p440_p9), %vm2422_vm0, %v2421_v1  ;;  %2210 = vmatprep.mubr.msk.bf16.mxu0 (!%p440_p9), %vm2422_vm0, %v2421_v1  ;;  %s2905_s2 = sld [smem:[#allocation8_spill]] (!%p440_p9)  ;;  %s2426_s30 = smov (!%p440_p9), 112   ;;  %v573_v15 = vunpack.c.l.s4 (!%p440_p9), %v2427_v14  ;;  %v576_v18 = vshrl.u32 (!%p440_p9), %v575_v16, 7  ;;  %v605_v20 = vunpack.c.l.s4 (!%p440_p9), %v2428_v19  ;;  %vm1010_vm2 = vcmask (!%p440_p9), 64512  }
  0x17   : > { %s2429_s16 = smov (!%p440_p9), 64   ;;  %s2906_s3 = sld [smem:[#allocation9_spill]] (!%p440_p9)  ;;  %vm1680_vm3 = vcmask (!%p440_p9), 130048   ;;  %vm1682_vm4 = vcmask (!%p440_p9), 195584  }
  0x18   : > { %v574_v17 = vunpack.c.0.s8 (!%p440_p9), %v573_v15  ;;  %v606_v26 = vunpack.c.0.s8 (!%p440_p9), %v605_v20  ;;  %s2907_s4 = sld [smem:[#allocation10_spill]] (!%p440_p9)  ;;  %s2145_s17 = sshll.u32 (!%p440_p9), %s2535_s22, 7 }
  0x1a   : > { %v2321_v0 = vld [vmem:[%s2903_s1] sm:$0xff] (!%p440_p9)   ;;  %v2322_v2 = vld [vmem:[%s2903_s1 + $0x8] sm:$0xff] (!%p440_p9)   ;;  %v2610_v23 = vsub.s32 (!%p440_p9), %v574_v17, %v576_v18  ;;  %v2620_v33 = vsub.s32 (!%p440_p9), %v606_v26, %v576_v18 }
  0x1b   : > { %2183 = vmatpush3.bf16.msra.mxu1 (!%p440_p9), %v2321_v0 }
  0x1c   : > { %2184 = vmatprep.subr.bf16.mxu1 %v2421_v1  ;;  %s487_s25 = scalar_select %p486_p10, %s2535_s22, 1  ;;  %v2101_v5 = vld [vmem:[%s2905_s2] ss:$0 sm:$0xff] }
  0x1d   : > { %s2433_s22 = smov [#allocation2]  }
  0x1e   : > { %s2100_s26 = sshll.u32 %s487_s25, 3  ;;  %s2424_s25 = smov 120  }
  0x1f   : > { %2185 = vmatpush3.bf16.msra.mxu1 %v2322_v2  ;;  %s489_s27 = scalar_lea.vmem %s2904_s0, %s2100_s26  ;;  %s2425_s26 = smov 96  }
  0x20   : > { %2190 = vmatprep.subr.bf16.mxu1 %v2421_v1  ;;  %v2581_v3 = vld [vmem:[%s489_s27] sm:$0xff]  ;;  %s2423_s27 = smov 104  }
  0x21   : > { %v492_v4 = vpack.c.bf16 %v2581_v3, %v2581_v3 }
  0x23   : > { %2187 = vmatmul.mubr.msk.bf16.vlgmr.msra.gmra.mrb[0].mxu1 %vm516_vm1, %v492_v4 }
  0x24   : > { %2192 = vmatprep.mubr.msk.bf16.mxu1 %vm2422_vm0, %v2421_v1 }
  0xf6   : > { %v554_v6 = vpop.f32.mrb[0].mxu1 }
  0xf7   : > { %v2591_v7 = vadd.f32 %v2101_v5, %v554_v6  ;;  %v2188_v8 = vpop.f32.mrb[1].mxu1 }
  0xf8   : > { %v557_v9 = vpop.f32.mrb[2].mxu1 }
  0xf9   : > { %567 = vrot.lane.b32.xlu1 %v2591_v7, %s2423_s27  ;;  %561 = vrot.lane.b32.xlu0 %v2591_v7, %s2424_s25  ;;  %v2189_v10 = vpop.f32.mrb[3].mxu1  ;;  %s483_s27 = sand.u32 1, %s2411_s19  }
  0xfa   : > { %s2099_s25 = sshll.u32 %s483_s27, 3 }
  0xfb   : > { %s485_s23 = scalar_lea.vmem [#allocation2], %s2099_s25  ;;  %s2361_s25 = sshll.u32 %s2433_s22, 4  ;;  %s2362_s25 = int_to_ptr.vmem [resolvable:$false] %s2361_s25 }
  0xfc   : > { %s2036_s1 = sshll.u32 %s485_s23, 4  ;;  %s2838_s1 = int_to_ptr.vmem [resolvable:$true] %s2036_s1 }
  0xfd   : > { %706 = vrot.lane.b32.xlu1 %v2591_v7, %s2425_s26  ;;  %564 = vrot.lane.b32.xlu0 %v2591_v7, %s2426_s30  ;;  %s2431_s30 = smov 8   ;;  %p2364_p0 = scmp.lt.s32.totalorder %s2838_s1, %s2362_s25 }
 0x16b   : > { %v2597_v11 = vpop.permute.xlu0 %561  ;;  %v2600_v12 = vpop.permute.xlu1 %567 }
 0x16c   : > { %708 = vrot.lane.b32.xlu0 %v2597_v11, %s2425_s26  ;;  %v586_v24 = vcombine.low %v2597_v11, %v2600_v12  ;;  %v587_v25 = vcombine.high %v2597_v11, %v2600_v12 }
 0x16e   : > { %v594_v29 = vrot.slane %v586_v24, %v2610_v23  ;;  %v601_v30 = vrot.slane %v587_v25, %v2610_v23 }
 0x16f   : > { %v2602_v13 = vpop.permute.xlu0 %564  ;;  %v707_v31 = vpop.permute.xlu1 %706 }
 0x170   : > { %712 = vrot.lane.b32.xlu0 %v2600_v12, %s2425_s26  ;;  %710 = vrot.lane.b32.xlu1 %v2602_v13, %s2425_s26  ;;  %v570_v21 = vcombine.low %v2591_v7, %v2602_v13  ;;  %v571_v22 = vcombine.high %v2591_v7, %v2602_v13  ;;  %s2430_s26 = smov 16  }
 0x172   : > { %v578_v27 = vrot.slane %v570_v21, %v2610_v23  ;;  %v585_v28 = vrot.slane %v571_v22, %v2610_v23 }
 0x174   : > { %v602_v34 = vcombine.low %v578_v27, %v594_v29  ;;  %v603_v35 = vcombine.high %v578_v27, %v594_v29  ;;  %v618_v36 = vcombine.low %v585_v28, %v601_v30  ;;  %v619_v37 = vcombine.high %v585_v28, %v601_v30 }
 0x176   : > { %v610_v44 = vrot.slane %v602_v34, %v2620_v33  ;;  %v617_v45 = vrot.slane %v603_v35, %v2620_v33  ;;  %v626_v46 = vrot.slane %v618_v36, %v2620_v33  ;;  %v633_v47 = vrot.slane %v619_v37, %v2620_v33 }
 0x178   : > { %v638_v56 = vcombine.low %v610_v44, %v617_v45  ;;  %v2105_v57 = vcombine.high %v610_v44, %v617_v45  ;;  %v654_v58 = vcombine.low %v626_v46, %v633_v47  ;;  %v2106_v59 = vcombine.high %v626_v46, %v633_v47 }
 0x17a   : > { %v645_v6 = vrot.slane %v638_v56, %v2610_v23  ;;  %v653_v8 = vrot.slane %v2105_v57, %v2610_v23  ;;  %v661_v9 = vrot.slane %v654_v58, %v2610_v23  ;;  %v669_v10 = vrot.slane %v2106_v59, %v2610_v23 }
 0x17c   : > { %v670_v22 = vcombine.low %v645_v6, %v653_v8  ;;  %v686_v24 = vcombine.low %v661_v9, %v669_v10  ;;  %v671_v25 = vcombine.high %v645_v6, %v653_v8  ;;  %v687_v26 = vcombine.high %v661_v9, %v669_v10 }
 0x17e   : > { %v678_v34 = vrot.slane %v670_v22, %v2620_v33  ;;  %v694_v35 = vrot.slane %v686_v24, %v2620_v33 }
 0x1de   : > { %v709_v32 = vpop.permute.xlu0 %708 }
 0x1e2   : > { %v711_v38 = vpop.permute.xlu1 %710  ;;  %v713_v39 = vpop.permute.xlu0 %712 }
 0x1e3   : > { %v718_v40 = vcombine.low %v707_v31, %v711_v38  ;;  %v719_v41 = vcombine.high %v707_v31, %v711_v38  ;;  %v734_v42 = vcombine.low %v709_v32, %v713_v39  ;;  %v735_v43 = vcombine.high %v709_v32, %v713_v39 }
 0x1e4   : > { %v685_v38 = vrot.slane %v671_v25, %v2620_v33  ;;  %v701_v39 = vrot.slane %v687_v26, %v2620_v33 }
 0x1e5   : > { %v726_v48 = vrot.slane %v718_v40, %v2610_v23  ;;  %v733_v49 = vrot.slane %v719_v41, %v2610_v23  ;;  %v742_v50 = vrot.slane %v734_v42, %v2610_v23  ;;  %v749_v51 = vrot.slane %v735_v43, %v2610_v23 }
 0x1e6   : > { %v702_v43 = vcombine.low %v678_v34, %v694_v35  ;;  %v705_v44 = vcombine.high %v685_v38, %v701_v39 }
 0x1e7   : > { %v750_v52 = vcombine.low %v726_v48, %v742_v50  ;;  %v751_v53 = vcombine.high %v726_v48, %v742_v50  ;;  %v766_v54 = vcombine.low %v733_v49, %v749_v51  ;;  %v767_v55 = vcombine.high %v733_v49, %v749_v51 }
 0x1e8   : > { %v1002_v46 = vpack.c.bf16 %v702_v43, %v702_v43  ;;  %v1005_v47 = vpack.c.bf16 %v705_v44, %v705_v44  ;;  %v703_v50 = vcombine.high %v678_v34, %v694_v35 }
 0x1e9   : > { %v758_v60 = vrot.slane %v750_v52, %v2620_v33  ;;  %v765_v61 = vrot.slane %v751_v53, %v2620_v33  ;;  %v774_v62 = vrot.slane %v766_v54, %v2620_v33  ;;  %v781_v63 = vrot.slane %v767_v55, %v2620_v33 }
 0x1ea   : > { %v1003_v52 = vpack.c.bf16 %v703_v50, %v703_v50  ;;  %v704_v54 = vcombine.low %v685_v38, %v701_v39 }
 0x1eb   : > { %v786_v0 = vcombine.low %v758_v60, %v765_v61  ;;  %v2107_v2 = vcombine.high %v758_v60, %v765_v61  ;;  %v802_v4 = vcombine.low %v774_v62, %v781_v63  ;;  %v2108_v5 = vcombine.high %v774_v62, %v781_v63 }
 0x1ec   : > { %v1004_v55 = vpack.c.bf16 %v704_v54, %v704_v54 }
 0x1ed   : > { %v793_v14 = vrot.slane %v786_v0, %v2610_v23  ;;  %v801_v15 = vrot.slane %v2107_v2, %v2610_v23  ;;  %v809_v16 = vrot.slane %v802_v4, %v2610_v23  ;;  %v817_v17 = vrot.slane %v2108_v5, %v2610_v23 }
 0x1ef   : > { %v818_v18 = vcombine.low %v793_v14, %v801_v15  ;;  %v834_v19 = vcombine.low %v809_v16, %v817_v17  ;;  %v819_v20 = vcombine.high %v793_v14, %v801_v15  ;;  %v835_v21 = vcombine.high %v809_v16, %v817_v17 }
 0x1f1   : > { %v826_v27 = vrot.slane %v818_v18, %v2620_v33  ;;  %v842_v28 = vrot.slane %v834_v19, %v2620_v33  ;;  %v833_v29 = vrot.slane %v819_v20, %v2620_v33  ;;  %v849_v30 = vrot.slane %v835_v21, %v2620_v33 }
 0x1f3   : > { %v850_v31 = vcombine.low %v826_v27, %v842_v28  ;;  %v853_v32 = vcombine.high %v833_v29, %v849_v30  ;;  %v851_v42 = vcombine.high %v826_v27, %v842_v28  ;;  %v852_v49 = vcombine.low %v833_v29, %v849_v30 }
 0x1f5   : > { %v1006_v36 = vpack.c.bf16 %v850_v31, %v850_v31  ;;  %v1009_v37 = vpack.c.bf16 %v853_v32, %v853_v32  ;;  %v1007_v45 = vpack.c.bf16 %v851_v42, %v851_v42  ;;  %v1008_v51 = vpack.c.bf16 %v852_v49, %v852_v49 }
 0x1f7   : > { %v1015_v40 = vsel %vm1010_vm2, %v1006_v36, 0  ;;  %v1153_v41 = vsel %vm1010_vm2, %v1009_v37, 0  ;;  %v1061_v48 = vsel %vm1010_vm2, %v1007_v45, 0  ;;  %v1107_v53 = vsel %vm1010_vm2, %v1008_v51, 0 }
 0x1f8   : > { %2191 = vmatpush3.bf16.xpose.msra.mxu1 %v1015_v40  ;;  %2209 = vmatpush3.bf16.xpose.msra.mxu0 %v1153_v41 }
 0x1f9   : > { %2196 = vmatprep.subr.bf16.mxu1 %v2421_v1  ;;  %2224 = vmatprep.subr.mxu0 %v2421_v1 }
 0x1ff   : > { %2193 = vmatmul.mubr.msk.bf16.vlgmr.msra.gmra.mrb[4].mxu1 %vm1010_vm2, %v1002_v46  ;;  %2211 = vmatmul.mubr.msk.bf16.vlgmr.msra.gmra.mrb[0].mxu0 %vm1010_vm2, %v1005_v47 }
 0x200   : > { %2197 = vmatpush3.bf16.xpose.msra.mxu1 %v1061_v48  ;;  %2198 = vmatprep.mubr.msk.bf16.mxu1 %vm2422_vm0, %v2421_v1 }
 0x201   : > { %2202 = vmatprep.subr.bf16.mxu1 %v2421_v1  ;;  %2226 = vmatprep.mubr.msk.f32.mxu0 %vm2422_vm0, %v2421_v1 }
 0x207   : > { %2199 = vmatmul.mubr.msk.bf16.vlgmr.msra.gmra.mrb[8].mxu1 %vm1010_vm2, %v1003_v52 }
 0x208   : > { %2203 = vmatpush3.bf16.xpose.msra.mxu1 %v1107_v53  ;;  %2204 = vmatprep.mubr.msk.bf16.mxu1 %vm2422_vm0, %v2421_v1 }
 0x209   : > { %2214 = vmatprep.subr.mxu1 %v2421_v1 }
 0x20f   : > { %2205 = vmatmul.mubr.msk.bf16.vlgmr.msra.gmra.mrb[12].mxu1 %vm1010_vm2, %v1004_v55 }
 0x210   : > { %2216 = vmatprep.mubr.msk.f32.mxu1 %vm2422_vm0, %v2421_v1 }
 0x2d2   : > { %v1051_v56 = vpop.f32.mrb[4].mxu1  ;;  %v1189_v57 = vpop.f32.mrb[0].mxu0 }
 0x2d3   : > { %v2194_v58 = vpop.f32.mrb[5].mxu1  ;;  %v2212_v59 = vpop.f32.mrb[1].mxu0  ;;  %v1195_v60 = vsel %vm1010_vm2, %v1051_v56, -inf  ;;  %v1204_v2 = vsel %vm1010_vm2, %v1189_v57, -inf }
 0x2d4   : > { %v1192_v61 = vpop.f32.mrb[2].mxu0  ;;  %1196 = vmax.xlane.f32.xlu1 %v1195_v60  ;;  %v1054_v62 = vpop.f32.mrb[6].mxu1 }
 0x2d5   : > { %v2195_v63 = vpop.f32.mrb[7].mxu1  ;;  %v2213_v0 = vpop.f32.mrb[3].mxu0 }
 0x2d8   : > { %1205 = vmax.xlane.f32.xlu1 %v1204_v2 }
 0x2da   : > { %v1097_v4 = vpop.f32.mrb[8].mxu1 }
 0x2db   : > { %v2200_v5 = vpop.f32.mrb[9].mxu1  ;;  %v1198_v6 = vsel %vm1010_vm2, %v1097_v4, -inf }
 0x2dc   : > { %1199 = vmax.xlane.f32.xlu0 %v1198_v6  ;;  %v1100_v8 = vpop.f32.mrb[10].mxu1 }
 0x2dd   : > { %v2201_v9 = vpop.f32.mrb[11].mxu1 }
 0x2e2   : > { %v1143_v10 = vpop.f32.mrb[12].mxu1 }
 0x2e3   : > { %v2206_v14 = vpop.f32.mrb[13].mxu1  ;;  %v1201_v15 = vsel %vm1010_vm2, %v1143_v10, -inf }
 0x2e4   : > { %1202 = vmax.xlane.f32.xlu0 %v1201_v15  ;;  %v1146_v16 = vpop.f32.mrb[14].mxu1 }
 0x2e5   : > { %v2207_v17 = vpop.f32.mrb[15].mxu1 }
 0x2e9   : > { %856 = vrot.lane.b32.xlu1 %v2597_v11, %s2429_s16 }
 0x2ed   : > { %858 = vrot.lane.b32.xlu1 %v2602_v13, %s2429_s16 }
 0x2fa   : > { %854 = vrot.lane.b32.xlu0 %v2591_v7, %s2429_s16 }
 0x361   : > { %v1197_v18 = vpop.xlane.xlu1 %1196 }
 0x362   : > { %v1207_v19 = vsub.f32 %v1051_v56, %v1197_v18 }
 0x364   : > { %v1211_v20 = vmul.f32 1.442695, %v1207_v19 }
 0x365   : > { %v1206_v31 = vpop.xlane.xlu1 %1205 }
 0x366   : > { %2335 = vpow2.f32 %v1211_v20  ;;  %v1210_v32 = vsub.f32 %v1189_v57, %v1206_v31 }
 0x368   : > { %v1217_v34 = vmul.f32 1.442695, %v1210_v32 }
 0x369   : > { %v1200_v21 = vpop.xlane.xlu0 %1199  ;;  %v857_v37 = vpop.permute.xlu1 %856 }
 0x36a   : > { %v1208_v22 = vsub.f32 %v1097_v4, %v1200_v21 }
 0x36c   : > { %v1213_v24 = vmul.f32 1.442695, %v1208_v22 }
 0x36d   : > { %v859_v40 = vpop.permute.xlu1 %858 }
 0x36e   : > { %2337 = vpow2.f32 %v1213_v24 }
 0x370   : > { %v2677_v25 = vpop.eup %2335 }
 0x371   : > { %v1203_v26 = vpop.xlane.xlu0 %1202  ;;  %v1219_v27 = vsel %vm1010_vm2, %v2677_v25, 0.0 }
 0x372   : > { %v1209_v28 = vsub.f32 %v1143_v10, %v1203_v26  ;;  %1220 = vadd.xlane.f32.xlu0 %v1219_v27 }
 0x374   : > { %v1215_v11 = vmul.f32 1.442695, %v1209_v28 }
 0x375   : > { %v855_v38 = vpop.permute.xlu0 %854 }
 0x376   : > { %2339 = vpow2.f32 %v1215_v11  ;;  %v866_v41 = vcombine.low %v855_v38, %v859_v40  ;;  %v867_v42 = vcombine.high %v855_v38, %v859_v40 }
 0x377   : > { %2341 = vpow2.f32 %v1217_v34 }
 0x378   : > { %v2681_v13 = vpop.eup %2337  ;;  %v881_v46 = vrot.slane %v867_v42, %v2610_v23 }
 0x379   : > { %v1222_v7 = vsel %vm1010_vm2, %v2681_v13, 0.0 }
 0x37a   : > { %1223 = vadd.xlane.f32.xlu1 %v1222_v7 }
 0x380   : > { %v2685_v29 = vpop.eup %2339 }
 0x381   : > { %v1225_v30 = vsel %vm1010_vm2, %v2685_v29, 0.0  ;;  %v2690_v35 = vpop.eup %2341 }
 0x382   : > { %1226 = vadd.xlane.f32.xlu1 %v1225_v30  ;;  %v1228_v36 = vsel %vm1010_vm2, %v2690_v35, 0.0 }
 0x388   : > { %860 = vrot.lane.b32.xlu0 %v2600_v12, %s2429_s16  ;;  %v874_v12 = vrot.slane %v866_v41, %v2610_v23  ;;  %s2432_s16 = smov 24  }
 0x3a7   : > { %1229 = vadd.xlane.f32.xlu0 %v1228_v36 }
 0x3ff   : > { %v1221_v39 = vpop.xlane.xlu0 %1220 }
 0x400   : > { %2343 = vrcp.f32 %v1221_v39 }
 0x403   : > { %v861_v43 = vpop.permute.xlu0 %860 }
 0x404   : > { %v882_v44 = vcombine.low %v857_v37, %v861_v43  ;;  %v883_v45 = vcombine.high %v857_v37, %v861_v43 }
 0x406   : > { %v890_v47 = vrot.slane %v882_v44, %v2610_v23  ;;  %v897_v48 = vrot.slane %v883_v45, %v2610_v23 }
 0x407   : > { %v1224_v53 = vpop.xlane.xlu1 %1223 }
 0x408   : > { %v898_v49 = vcombine.low %v874_v12, %v890_v47  ;;  %v899_v50 = vcombine.high %v874_v12, %v890_v47  ;;  %v914_v51 = vcombine.low %v881_v46, %v897_v48  ;;  %v915_v52 = vcombine.high %v881_v46, %v897_v48  ;;  %v2323_v48 = vld [vmem:[%s2906_s3] sm:$0xff]  }
 0x409   : > { %2345 = vrcp.f32 %v1224_v53 }
 0x40a   : > { %v906_v54 = vrot.slane %v898_v49, %v2620_v33  ;;  %v913_v55 = vrot.slane %v899_v50, %v2620_v33  ;;  %v922_v56 = vrot.slane %v914_v51, %v2620_v33  ;;  %v929_v57 = vrot.slane %v915_v52, %v2620_v33  ;;  %v2344_v9 = vpop.eup %2343 }
 0x40b   : > { %v1235_v20 = vmul.f32 %v2344_v9, %v2677_v25 }
 0x40c   : > { %v934_v58 = vcombine.low %v906_v54, %v913_v55  ;;  %v2109_v59 = vcombine.high %v906_v54, %v913_v55  ;;  %v950_v60 = vcombine.low %v922_v56, %v929_v57  ;;  %v2110_v61 = vcombine.high %v922_v56, %v929_v57  ;;  %v2324_v57 = vld [vmem:[%s2906_s3 + $0x8] sm:$0xff]  }
 0x40e   : > { %v941_v62 = vrot.slane %v934_v58, %v2610_v23  ;;  %v949_v63 = vrot.slane %v2109_v59, %v2610_v23  ;;  %v957_v0 = vrot.slane %v950_v60, %v2610_v23  ;;  %v965_v2 = vrot.slane %v2110_v61, %v2610_v23 }
 0x40f   : > { %v1227_v4 = vpop.xlane.xlu1 %1226 }
 0x410   : > { %2347 = vrcp.f32 %v1227_v4  ;;  %v966_v5 = vcombine.low %v941_v62, %v949_v63  ;;  %v982_v6 = vcombine.low %v957_v0, %v965_v2  ;;  %v967_v8 = vcombine.high %v941_v62, %v949_v63 }
 0x411   : > { %v983_v10 = vcombine.high %v957_v0, %v965_v2 }
 0x412   : > { %v974_v14 = vrot.slane %v966_v5, %v2620_v33  ;;  %v990_v15 = vrot.slane %v982_v6, %v2620_v33  ;;  %v981_v16 = vrot.slane %v967_v8, %v2620_v33 }
 0x413   : > { %v997_v17 = vrot.slane %v983_v10, %v2620_v33  ;;  %v2346_v19 = vpop.eup %2345 }
 0x414   : > { %v998_v18 = vcombine.low %v974_v14, %v990_v15  ;;  %v999_v22 = vcombine.high %v974_v14, %v990_v15  ;;  %v1236_v24 = vmul.f32 %v2346_v19, %v2681_v13 }
 0x415   : > { %v1000_v21 = vcombine.low %v981_v16, %v997_v17  ;;  %v1001_v25 = vcombine.high %v981_v16, %v997_v17 }
 0x416   : > { %2215 = vmatpush3.msra.mxu1 %v998_v18 }
 0x417   : > { %2225 = vmatpush3.msra.mxu0 %v1000_v21  ;;  %2217 = vmatmul.mubr.msk.f32.vlgmr.msra.gmra.mrb[16].mxu1 %vm1010_vm2, %v1235_v20  ;;  %v2121_v21 = vld [vmem:[%s2907_s4] ss:$0 sm:$0xff]  ;;  %s2836_s4 = scalar_lea.hbm %s2894_s15, %s2145_s17 }
 0x418   : > { %2219 = vmatprep.subr.mxu1 %v2421_v1  ;;  %2221 = vmatprep.mubr.msk.f32.mxu1 %vm2422_vm0, %v2421_v1 }
 0x419   : > { %2220 = vmatpush3.msra.mxu1 %v999_v22  ;;  %2234 = vmatprep.subr.bf16.mxu0 %v2421_v1 }
 0x41a   : > { %v2348_v26 = vpop.eup %2347  ;;  %2229 = vmatprep.subr.mxu1 %v2421_v1 }
 0x41b   : > { %v1237_v27 = vmul.f32 %v2348_v26, %v2685_v29  ;;  %2222 = vmatmul.mubr.msk.f32.vlgmr.msra.gmra.mrb[18].mxu1 %vm1010_vm2, %v1236_v24 }
 0x41c   : > { %2230 = vmatpush3.msra.mxu1 %v1001_v25  ;;  %2231 = vmatprep.mubr.msk.f32.mxu1 %vm2422_vm0, %v2421_v1 }
 0x41d   : > { %2227 = vmatmul.mubr.msk.f32.vlgmr.msra.gmra.mrb[4].mxu0 %vm1010_vm2, %v1237_v27  ;;  %2242 = vmatprep.subr.bf16.mxu1 %v2421_v1 }
 0x41e   : > { %2238 = vmatprep.mubr.msk.bf16.mxu0 %vm2422_vm0, %v2421_v1  ;;  %2235 = vmatpush3.bf16.msra.mxu0 %v2323_v48 }
 0x41f   : > { %2236 = vmatprep.subr.bf16.mxu0 %v2421_v1 }
 0x422   : > { %2237 = vmatpush3.bf16.msra.mxu0 %v2324_v57 }
 0x423   : > { %2250 = vmatprep.subr.bf16.mxu0 %v2421_v1 }
 0x434   : > { %v1230_v28 = vpop.xlane.xlu0 %1229 }
 0x435   : > { %2349 = vrcp.f32 %v1230_v28 }
 0x43f   : > { %v2350_v11 = vpop.eup %2349 }
 0x440   : > { %v1238_v13 = vmul.f32 %v2350_v11, %v2690_v35 }
 0x442   : > { %2232 = vmatmul.mubr.msk.f32.vlgmr.msra.gmra.mrb[20].mxu1 %vm1010_vm2, %v1238_v13 }
 0x443   : > { %2246 = vmatprep.mubr.msk.bf16.mxu1 %vm2422_vm0, %v2421_v1 }
 0x4ea   : > { %v1308_v7 = vpop.f32.mrb[16].mxu1 }
 0x4eb   : > { %v2218_v29 = vpop.f32.mrb[17].mxu1 }
 0x4ee   : > { %v1381_v30 = vpop.f32.mrb[18].mxu1 }
 0x4ef   : > { %v2223_v31 = vpop.f32.mrb[19].mxu1 }
 0x4f0   : > { %v1454_v32 = vpop.f32.mrb[4].mxu0 }
 0x4f1   : > { %v1531_v34 = vcombine.low %v1308_v7, %v1454_v32  ;;  %v1532_v36 = vcombine.high %v1308_v7, %v1454_v32  ;;  %v2228_v37 = vpop.f32.mrb[5].mxu0  ;;  %v2325_v32 = vld [vmem:[%s2888_s9] sm:$0xff]  }
 0x4f2   : > { %2243 = vmatpush3.bf16.msra.mxu1 %v2325_v32  ;;  %v2329_v37 = vld [vmem:[%s2890_s11 + $0x10] sm:$0xff]  }
 0x4f3   : > { %v1539_v42 = vrot.slane %v1531_v34, %v2610_v23  ;;  %v1546_v35 = vrot.slane %v1532_v36, %v2610_v23  ;;  %v2326_v34 = vld [vmem:[%s2888_s9 + $0x8] sm:$0xff]   ;;  %2244 = vmatprep.subr.bf16.mxu1 %v2421_v1 }
 0x4f4   : > { %v2328_v36 = vld [vmem:[%s2890_s11 + $0x8] sm:$0xff]  }
 0x4f6   : > { %2245 = vmatpush3.bf16.msra.mxu1 %v2326_v34 }
 0x515   : > { %v1527_v38 = vpop.f32.mrb[20].mxu1 }
 0x516   : > { %v1547_v39 = vcombine.low %v1381_v30, %v1527_v38  ;;  %v1548_v40 = vcombine.high %v1381_v30, %v1527_v38  ;;  %v2233_v41 = vpop.f32.mrb[21].mxu1  ;;  %v2330_v38 = vld [vmem:[%s2890_s11 + $0x18] sm:$0xff]  }
 0x518   : > { %v1555_v43 = vrot.slane %v1547_v39, %v2610_v23  ;;  %v1562_v44 = vrot.slane %v1548_v40, %v2610_v23  ;;  %v2331_v39 = vld [vmem:[%s2890_s11 + $0x20] sm:$0xff]   ;;  %v2332_v40 = vld [vmem:[%s2890_s11 + $0x28] sm:$0xff]  }
 0x51a   : > { %v1563_v45 = vcombine.low %v1539_v42, %v1555_v43  ;;  %v1564_v12 = vcombine.high %v1539_v42, %v1555_v43  ;;  %v1579_v46 = vcombine.low %v1546_v35, %v1562_v44  ;;  %v1580_v47 = vcombine.high %v1546_v35, %v1562_v44  ;;  %v2125_v44 = vld [vmem:[%s2884_s5] ss:$0 sm:$0xff] }
 0x51c   : > { %v1571_v49 = vrot.slane %v1563_v45, %v2620_v33  ;;  %v1578_v50 = vrot.slane %v1564_v12, %v2620_v33  ;;  %v1587_v51 = vrot.slane %v1579_v46, %v2620_v33  ;;  %v1594_v52 = vrot.slane %v1580_v47, %v2620_v33  ;;  %v2126_v12 = vld [vmem:[%s2885_s6] ss:$0 sm:$0xff] }
 0x51e   : > { %v1599_v53 = vcombine.low %v1571_v49, %v1578_v50  ;;  %v2119_v54 = vcombine.high %v1571_v49, %v1578_v50  ;;  %v1615_v55 = vcombine.low %v1587_v51, %v1594_v52  ;;  %v2120_v56 = vcombine.high %v1587_v51, %v1594_v52  ;;  %v2333_v49 = vld [vmem:[%s2890_s11 + $0x30] sm:$0xff]   ;;  %v2334_v50 = vld [vmem:[%s2890_s11 + $0x38] sm:$0xff]   ;;  %v2127_v51 = vld [vmem:[%s2889_s10] ss:$0 sm:$0xff] }
 0x520   : > { %v1606_v58 = vrot.slane %v1599_v53, %v2610_v23  ;;  %v1614_v59 = vrot.slane %v2119_v54, %v2610_v23  ;;  %v1622_v60 = vrot.slane %v1615_v55, %v2610_v23  ;;  %v1630_v61 = vrot.slane %v2120_v56, %v2610_v23 }
 0x522   : > { %v1632_v62 = vcombine.high %v1606_v58, %v1614_v59  ;;  %v1648_v63 = vcombine.high %v1622_v60, %v1630_v61  ;;  %v1631_v0 = vcombine.low %v1606_v58, %v1614_v59  ;;  %v1647_v2 = vcombine.low %v1622_v60, %v1630_v61 }
 0x524   : > { %v1646_v4 = vrot.slane %v1632_v62, %v2620_v33  ;;  %v1662_v5 = vrot.slane %v1648_v63, %v2620_v33  ;;  %v1639_v6 = vrot.slane %v1631_v0, %v2620_v33  ;;  %v1655_v8 = vrot.slane %v1647_v2, %v2620_v33 }
 0x526   : > { %v1665_v9 = vcombine.low %v1646_v4, %v1662_v5  ;;  %v1664_v10 = vcombine.high %v1639_v6, %v1655_v8  ;;  %v1666_v14 = vcombine.high %v1646_v4, %v1662_v5  ;;  %v1663_v15 = vcombine.low %v1639_v6, %v1655_v8 }
 0x528   : > { %1672 = vrot.lane.b32.xlu1 %v1665_v9, %s2430_s26  ;;  %1668 = vrot.lane.b32.xlu0 %v1664_v10, %s2431_s30  ;;  %s2023_s26 = scalar_lea.sflag [#allocation3], %s483_s27  ;;  %s2357_s30 = scalar_lea.vmem %s2838_s1, 128 }
 0x529   : > { %p2358_p11 = scmp.ne.s32.totalorder %s2838_s1, %s2357_s30 }
 0x52b   : > { %p2359_p12 = pnand %p2358_p11, %p2552_p5 }
 0x52c   : > { %1676 = vrot.lane.b32.xlu1 %v1666_v14, %s2432_s16  ;;  %s2363_s16 = scalar_lea.vmem %s2362_s25, 256 }
 0x52d   : > { %p2360_p13 = pneg %p2359_p12  ;;  %p2365_p1 = scmp.lt.s32.totalorder %s2363_s16, %s2357_s30 }
 0x52f   : > { %p2366_p2 = por %p2365_p1, %p2364_p0 }
 0x531   : > { %p2367_p3 = pnand %p2366_p2, %p2360_p13 }
 0x59a   : > { %v1673_v23 = vpop.permute.xlu1 %1672  ;;  %v1669_v16 = vpop.permute.xlu0 %1668 }
 0x59b   : > { %v1679_v17 = vsel %vm1010_vm2, %v1663_v15, %v1669_v16  ;;  %v2140_v16 = vld [vmem:[%s2886_s7] ss:$0 sm:$0xff] }
 0x59c   : > { %v1681_v19 = vsel %vm1680_vm3, %v1679_v17, %v1673_v23 }
 0x59e   : > { %v1677_v18 = vpop.permute.xlu1 %1676 }
 0x59f   : > { %v1683_v20 = vsel %vm1682_vm4, %v1681_v19, %v1677_v18  ;;  %v2141_v18 = vld [vmem:[%s2887_s8] ss:$0 sm:$0xff] }
 0x5a0   : > { %v1684_v33 = vpack.c.bf16 %v1683_v20, %v1683_v20 }
 0x5a2   : > { %2239 = vmatmul.mubr.msk.bf16.vlgmr.msra.gmra.mrb[8].mxu0 %vm516_vm1, %v1684_v33 }
 0x5a3   : > { %2266 = vmatprep.mubr.msk.bf16.mxu0 %vm2422_vm0, %v2421_v1 }
 0x675   : > { %v1745_v22 = vpop.f32.mrb[8].mxu0 }
 0x676   : > { %v1746_v24 = vadd.f32 %v2121_v21, %v1745_v22  ;;  %v2240_v26 = vpop.f32.mrb[9].mxu0 }
 0x677   : > { %v1748_v25 = vpop.f32.mrb[10].mxu0 }
 0x678   : > { %v2241_v27 = vpop.f32.mrb[11].mxu0  ;;  %v1751_v28 = vadd.f32 %v1746_v24, %v2581_v3  ;;  %v2327_v3 = vld [vmem:[%s2890_s11] sm:$0xff]  }
 0x679   : > { %2251 = vmatpush3.bf16.msra.mxu0 %v2327_v3 }
 0x67a   : > { %v1754_v11 = vsel %vm516_vm1, %v1751_v28, 0.0  ;;  %2252 = vmatprep.subr.bf16.mxu0 %v2421_v1 }
 0x67b   : > { %1755 = vadd.xlane.f32.xlu0 %v1754_v11 }
 0x67d   : > { %2253 = vmatpush3.bf16.msra.mxu0 %v2328_v36 }
 0x67e   : > { %2254 = vmatprep.subr.bf16.mxu0 %v2421_v1 }
 0x681   : > { %2255 = vmatpush3.bf16.msra.mxu0 %v2329_v37 }
 0x682   : > { %2256 = vmatprep.subr.bf16.mxu0 %v2421_v1 }
 0x685   : > { %2257 = vmatpush3.bf16.msra.mxu0 %v2330_v38 }
 0x686   : > { %2258 = vmatprep.subr.bf16.mxu0 %v2421_v1 }
 0x689   : > { %2259 = vmatpush3.bf16.msra.mxu0 %v2331_v39 }
 0x68a   : > { %2260 = vmatprep.subr.bf16.mxu0 %v2421_v1 }
 0x68d   : > { %2261 = vmatpush3.bf16.msra.mxu0 %v2332_v40 }
 0x68e   : > { %2262 = vmatprep.subr.bf16.mxu0 %v2421_v1 }
 0x691   : > { %2263 = vmatpush3.bf16.msra.mxu0 %v2333_v49 }
 0x692   : > { %2264 = vmatprep.subr.bf16.mxu0 %v2421_v1  ;;  %v2131_v1 = vld [vmem:[%s2891_s12] ss:$0 sm:$0xff] }
 0x695   : > { %2265 = vmatpush3.bf16.msra.mxu0 %v2334_v50 }
 0x708   : > { %v1756_v13 = vpop.xlane.xlu0 %1755 }
 0x709   : > { %v1758_v7 = vmul.f32 0.03125, %v1756_v13 }
 0x70b   : > { %v1759_v29 = vsub.f32 %v1751_v28, %v1758_v7  ;;  %v2142_v7 = vld [vmem:[%s2892_s13] ss:$0 sm:$0xff] }
 0x70d   : > { %v1760_v30 = vmul.f32 %v1759_v29, %v1759_v29 }
 0x70f   : > { %v1761_v31 = vsel %vm516_vm1, %v1760_v30, 0.0  ;;  %v2143_v30 = vld [vmem:[%s2893_s14] ss:$0 sm:$0xff] }
 0x710   : > { %1762 = vadd.xlane.f32.xlu1 %v1761_v31 }
 0x79d   : > { %v1763_v41 = vpop.xlane.xlu1 %1762 }
 0x79e   : > { %v1764_v42 = vmul.f32 0.03125, %v1763_v41 }
 0x7a0   : > { %v1765_v35 = vadd.f32 1e-05, %v1764_v42 }
 0x7a2   : > { %2351 = vrsqrt.f32 %v1765_v35 }
 0x7ac   : > { %v2352_v43 = vpop.eup %2351 }
 0x7ad   : > { %v1767_v45 = vmul.f32 %v2352_v43, %v1759_v29 }
 0x7af   : > { %v1774_v46 = vmul.f32 %v2125_v44, %v1767_v45 }
 0x7b1   : > { %v1781_v47 = vadd.f32 %v2126_v12, %v1774_v46 }
 0x7b3   : > { %v1782_v48 = vpack.c.bf16 %v1781_v47, %v1781_v47 }
 0x7b5   : > { %2247 = vmatmul.mubr.msk.bf16.vlgmr.msra.gmra.mrb[24].mxu1 %vm516_vm1, %v1782_v48 }
 0x888   : > { %v1843_v52 = vpop.f32.mrb[24].mxu1 }
 0x889   : > { %v1844_v53 = vadd.f32 %v2127_v51, %v1843_v52  ;;  %v2248_v54 = vpop.f32.mrb[25].mxu1 }
 0x88a   : > { %v1846_v55 = vpop.f32.mrb[26].mxu1 }
 0x88b   : > { %v1849_v56 = vmax.f32 %v1844_v53, 0.0  ;;  %v2249_v57 = vpop.f32.mrb[27].mxu1 }
 0x88d   : > { %v1850_v58 = vpack.c.bf16 %v1849_v56, %v1849_v56 }
 0x88f   : > { %2267 = vmatmul.mubr.bf16.vlgmr.msra.gmra.mrb[12].mxu0 %v1850_v58 }
 0x962   : > { %v1956_v59 = vpop.f32.mrb[12].mxu0 }
 0x963   : > { %v1957_v60 = vadd.f32 %v2131_v1, %v1956_v59  ;;  %v2268_v61 = vpop.f32.mrb[13].mxu0 }
 0x964   : > { %v1959_v62 = vpop.f32.mrb[14].mxu0 }
 0x965   : > { %v2269_v63 = vpop.f32.mrb[15].mxu0  ;;  %v1962_v0 = vadd.f32 %v1957_v60, %v1781_v47 }
 0x967   : > { %v1965_v2 = vsel %vm516_vm1, %v1962_v0, 0.0 }
 0x968   : > { %1966 = vadd.xlane.f32.xlu0 %v1965_v2 }
 0x9f5   : > { %v1967_v4 = vpop.xlane.xlu0 %1966 }
 0x9f6   : > { %v1968_v5 = vmul.f32 0.03125, %v1967_v4 }
 0x9f8   : > { %v1969_v6 = vsub.f32 %v1962_v0, %v1968_v5 }
 0x9fa   : > { %v1970_v8 = vmul.f32 %v1969_v6, %v1969_v6 }
 0x9fc   : > { %v1971_v9 = vsel %vm516_vm1, %v1970_v8, 0.0 }
 0x9fd   : > { %1972 = vadd.xlane.f32.xlu0 %v1971_v9 }
 0xa8a   : > { %v1973_v10 = vpop.xlane.xlu0 %1972 }
 0xa8b   : > { %v1974_v14 = vmul.f32 0.03125, %v1973_v10 }
 0xa8d   : > { %v1975_v15 = vadd.f32 1e-05, %v1974_v14 }
 0xa8f   : > { %2353 = vrsqrt.f32 %v1975_v15 }
 0xa99   : > { %v2354_v23 = vpop.eup %2353 }
 0xa9a   : > { %v1977_v17 = vmul.f32 %v2354_v23, %v1969_v6 }
 0xa9c   : > { %v1984_v19 = vmul.f32 %v2140_v16, %v1977_v17 }
 0xa9e   : > { %v1991_v20 = vadd.f32 %v2141_v18, %v1984_v19 }
 0xaa0   : > { %v1994_v33 = vsel %vm516_vm1, %v1991_v20, 0.0 }
 0xaa1   : > { %1995 = vadd.xlane.f32.xlu1 %v1994_v33 }
 0xb2e   : > { %v1996_v21 = vpop.xlane.xlu1 %1995 }
 0xb2f   : > { %v1997_v22 = vmul.f32 0.03125, %v1996_v21 }
 0xb31   : > { %v1998_v24 = vsub.f32 %v1991_v20, %v1997_v22 }
 0xb33   : > { %v1999_v26 = vmul.f32 %v1998_v24, %v1998_v24 }
 0xb35   : > { %v2000_v25 = vsel %vm516_vm1, %v1999_v26, 0.0 }
 0xb36   : > { %2001 = vadd.xlane.f32.xlu0 %v2000_v25 }
 0xbc3   : > { %v2002_v27 = vpop.xlane.xlu0 %2001 }
 0xbc4   : > { %v2003_v28 = vmul.f32 0.03125, %v2002_v27 }
 0xbc6   : > { %v2004_v11 = vadd.f32 1e-05, %v2003_v28 }
 0xbc8   : > { %2355 = vrsqrt.f32 %v2004_v11 }
 0xbd2   : > { %v2356_v13 = vpop.eup %2355 }
 0xbd3   : > { %v2006_v29 = vmul.f32 %v2356_v13, %v1998_v24 }
 0xbd5   : > { %v2013_v31 = vmul.f32 %v2142_v7, %v2006_v29 }
 0xbd7   : > { %v2020_v32 = vadd.f32 %v2143_v30, %v2013_v31 }
 0xbd9   : > { %2021 = vst.msk [vmem:[%s485_s23] sm:$0xff] %vm516_vm1, %v2020_v32 }
 0xbda   : > { %2370 = shalt.err (!%p2367_p3)
}
 0xbdb   : > { %s2371_s2 = scalar_lea.hbm %s2836_s4, 128  ;;  %s2375_s0 = scalar_lea.hbm %s2894_s15, 256 }
 0xbdc   : > { %p2372_p4 = scmp.ne.s32.totalorder %s2836_s4, %s2371_s2  ;;  %p2376_p9 = scmp.lt.u32.totalorder %s2836_s4, %s2894_s15 }
 0xbdd   : > { %p2377_p10 = scmp.lt.u32.totalorder %s2375_s0, %s2371_s2  ;;  %p2379_p12 = scmp.lt.u32.totalorder %s2371_s2, %s2836_s4 }
 0xbde   : > { %p2373_p7 = pnand %p2372_p4, %p2552_p5 }
 0xbdf   : > { %p2378_p11 = por %p2377_p10, %p2376_p9 }
 0xbe0   : > { %p2374_p8 = pneg %p2373_p7 }
 0xbe1   : > { %p2380_p13 = por %p2379_p12, %p2378_p11 }
 0xbe3   : > { %p2381_p0 = pnand %p2380_p13, %p2374_p8 }
 0xbe5   : > { %2384 = shalt.err (!%p2381_p0)
}
 0xbe6   : > { %2270 = dma.vmem_to_hbm [thread:$0]  (%p2552_p5), %s2838_s1, 128, %s2836_s4, %s2023_s26  }
 0xbe7 PF: > { %p2276_p1 = scmp.ge.s32.totalorder %s2419_s21, 2  ;;  %s2048_s30 = sand.u32 1, %s2407_s18  }
 0xbe8   : > { %s2049_s22 = scalar_lea.sflag [#allocation3], %s2048_s30 }
 0xbe9   : > { %p2273_p2 = pnand %p2276_p1, %p2556_p6 }
 0xbeb   : > { %2402 = dma.done.wait (!%p2273_p2), %s2049_s22, 128  }
 0xbec   : > { %2404 = vsyncadd (!%p2273_p2), %s2049_s22, 4294967168  ;;  %s2908_s25 = sld [smem:[#allocation5_spill]]  ;;  %p25_p3 = scmp.ge.s32.totalorder %s2539_s24, 4  }
 0xbed   : > { %s2909_s18 = smov %s2411_s19  ;;  %s2910_s19 = smov %s2415_s20 }
 0xbee   : > { %s2912_s21 = smov %s2539_s24  ;;  %27 = sbr.rel (!%p25_p3) target bundleno = 9 (0x9), region = 115 }
 0xbf2   : > { %s2911_s20 = smov %s2908_s25 }
 0xbf5   :  { %2054 = vsyncpa [#allocation3], 1 }
 0xbf6   :  { %2056 = vsyncpa [#allocation3 + $0x1], 1 }

</bundles_post_ra>
